<compile_context>
chip_gen: v5e
topology: v5e:2x2
jax: 0.10.0
libtpu: 0.0.40
codegen_flags: <defaults>
</compile_context>

<pallas_src>
import functools

import jax
import jax.numpy as jnp
from jax.experimental import pallas as pl
from jax.experimental.pallas import tpu as pltpu


def _mlp_kernel(x_ref, w1_ref, b1_ref, w2_ref, b2_ref, o_ref, *, compute_dtype):
    # Token-major layout (tokens on the sublane axis):
    #   x_ref : (tn, D)        token tile (contiguous rows of the input)
    #   w1_ref: (D, dff)       full first-layer weight, VMEM-resident
    #   b1_ref: (1, dff)       f32 bias row
    #   w2_ref: (dff, d_out)   full second-layer weight, VMEM-resident
    #   b2_ref: (1, d_out)     f32 bias row
    #   o_ref : (tn, d_out)    token tile of the output
    x = x_ref[...].astype(compute_dtype)                      # cast in-registers (no HBM cost)
    h = jnp.dot(x, w1_ref[...], preferred_element_type=jnp.float32)
    h = jnp.maximum(h + b1_ref[...], 0.0)                     # bias + ReLU in f32 (v5e-safe)
    o = jnp.dot(h.astype(compute_dtype), w2_ref[...],
                preferred_element_type=jnp.float32)
    o = o + b2_ref[...]
    o_ref[...] = o.astype(o_ref.dtype)


def embed_decoder_fc(embed, w1, b1, w2, b2, *, tile_n=4096,
                     compute_dtype=jnp.bfloat16, min_pallas_tokens=512):
    """EmbedDecoder forward with model=['', 'fc']:
        Linear(dembed, dff) -> ReLU -> Linear(dff, dembed_out)

    embed: (B, N, dembed); w1: (dembed, dff); w2: (dff, dembed_out)
    (weights stored as (in_features, out_features), i.e. torch W.T).
    compute_dtype: dtype fed to the MXU (default bf16 on all TPU generations;
    accumulation, bias adds and ReLU are always f32).
    Returns (B, N, dembed_out) in embed.dtype.
    """
    B, N, D = embed.shape
    dff = w1.shape[1]
    d_out = w2.shape[1]
    M = B * N
    out_dtype = embed.dtype

    if compute_dtype is None:
        compute_dtype = embed.dtype

    w1c = w1.astype(compute_dtype)                 # tiny; one-off cast
    w2c = w2.astype(compute_dtype)
    b1r = b1.astype(jnp.float32).reshape(1, dff)
    b2r = b2.astype(jnp.float32).reshape(1, d_out)

    # Tiny problems: kernel-launch / pipeline overheads dwarf the few us of
    # work -> let plain XLA handle it.
    if M < min_pallas_tokens:
        h = jnp.maximum(
            jnp.dot(embed.astype(compute_dtype), w1c,
                    preferred_element_type=jnp.float32) + b1r[0], 0.0)
        o = jnp.dot(h.astype(compute_dtype), w2c,
                    preferred_element_type=jnp.float32) + b2r[0]
        return o.astype(out_dtype)

    x2d = embed.reshape(M, D)                      # free reshape, no copy

    # ---- token-tile selection ------------------------------------------
    # * large M : tile_n-token tiles (multiple of 128), ragged tail clipped
    # * medium M: split into 2 steps so both v7x TensorCores get work
    # * small M : single full-extent block
    if M >= 2 * tile_n:
        tn = tile_n
    elif M >= 1024:
        tn = ((pl.cdiv(M, 2) + 127) // 128) * 128
    else:
        tn = M
    grid = (pl.cdiv(M, tn),)

    out2d = pl.pallas_call(
        functools.partial(_mlp_kernel, compute_dtype=compute_dtype),
        out_shape=jax.ShapeDtypeStruct((M, d_out), out_dtype),
        grid_spec=pl.GridSpec(
            grid=grid,
            in_specs=[
                pl.BlockSpec((tn, D), lambda i: (i, 0)),         # x tile (contiguous DMA)
                pl.BlockSpec((D, dff), lambda i: (0, 0)),        # W1 (full, resident)
                pl.BlockSpec((1, dff), lambda i: (0, 0)),        # b1
                pl.BlockSpec((dff, d_out), lambda i: (0, 0)),    # W2 (full, resident)
                pl.BlockSpec((1, d_out), lambda i: (0, 0)),      # b2
            ],
            out_specs=pl.BlockSpec((tn, d_out), lambda i: (i, 0)),
        ),
        compiler_params=pltpu.CompilerParams(
            dimension_semantics=("parallel",)),    # independent steps -> v7x dual-TC
    )(x2d, w1c, b1r, w2c, b2r)

    return out2d.reshape(B, N, d_out)


if __name__ == "__main__":
    # Module hyper-parameters (consistent with the PyTorch __init__):
    #   sig_shape = (nf, nt, nreim, nmic) = (16, 8, 2, 2), patch_shape = (4, 2)
    #   -> dpatch = 8, npatch = 16, dembed = 32, dembed_out = 32, dff = 96
    nf, nt, nreim, nmic = 16, 8, 2, 2
    patch_shape = (4, 2)
    dpatch = patch_shape[0] * patch_shape[1]
    npatch = (nf // patch_shape[0]) * (nt // patch_shape[1])
    dembed = 32
    dembed_out = dpatch * nreim * nmic
    dff = dembed_out * 3

    key = jax.random.PRNGKey(0)
    k_x, k_w1, k_b1, k_w2, k_b2, k_x2, k_x3 = jax.random.split(key, 7)

    # Deterministic parameter init (Kaiming-uniform-like scale, as in nn.Linear).
    lim1 = 1.0 / jnp.sqrt(dembed)
    lim2 = 1.0 / jnp.sqrt(dff)
    w1 = jax.random.uniform(k_w1, (dembed, dff), jnp.float32, -lim1, lim1)
    b1 = jax.random.uniform(k_b1, (dff,), jnp.float32, -lim1, lim1)
    w2 = jax.random.uniform(k_w2, (dff, dembed_out), jnp.float32, -lim2, lim2)
    b2 = jax.random.uniform(k_b2, (dembed_out,), jnp.float32, -lim2, lim2)

    def reference_fc(e):
        return jnp.maximum(e @ w1 + b1, 0.0) @ w2 + b2

    # Case 1: tiny (B*N = 32) -> XLA short-circuit path, exact f32.
    embed = jax.random.normal(k_x, (2, npatch, dembed), dtype=jnp.float32)
    out = jax.block_until_ready(
        embed_decoder_fc(embed, w1, b1, w2, b2, compute_dtype=jnp.float32))
    assert out.shape == (2, npatch, dembed_out)
    assert jnp.allclose(out, reference_fc(embed), atol=1e-4, rtol=1e-4)

    # Case 2: Pallas path, multi-step grid with ragged tail
    # (M = 40*16 = 640, 256-token tiles -> 3 steps, last one partial), f32.
    embed2 = jax.random.normal(k_x2, (40, npatch, dembed), dtype=jnp.float32)
    out2 = jax.block_until_ready(
        embed_decoder_fc(embed2, w1, b1, w2, b2, tile_n=256,
                         compute_dtype=jnp.float32, min_pallas_tokens=0))
    assert out2.shape == (40, npatch, dembed_out)
    assert jnp.allclose(out2, reference_fc(embed2), atol=1e-4, rtol=1e-4)

    # Case 3: medium M (= 80*16 = 1280) -> auto-split into 2 "parallel" steps,
    # default bf16 MXU inputs with f32 accumulation / bias / ReLU.
    embed3 = jax.random.normal(k_x3, (80, npatch, dembed), dtype=jnp.float32)
    out3 = jax.block_until_ready(embed_decoder_fc(embed3, w1, b1, w2, b2))
    assert out3.shape == (80, npatch, dembed_out)
    assert jnp.allclose(out3, reference_fc(embed3), atol=1e-1, rtol=1e-1)

    print("KERNEL_OK")
</pallas_src>

<mosaic_0001>
module attributes {stable_mosaic.version = 11 : i64} {
  func.func @_mlp_kernel(%arg0: i32, %arg1: memref<256x32xf32, #tpu.memory_space<vmem>>, %arg2: memref<32x96xf32, #tpu.memory_space<vmem>>, %arg3: memref<1x96xf32, #tpu.memory_space<vmem>>, %arg4: memref<96x32xf32, #tpu.memory_space<vmem>>, %arg5: memref<1x32xf32, #tpu.memory_space<vmem>>, %arg6: memref<256x32xf32, #tpu.memory_space<vmem>>) attributes {dimension_semantics = [#tpu.dimension_semantics<parallel>], iteration_bounds = array<i64: 3>, scalar_prefetch = 0 : i64, scratch_operands = 0 : i64, tpu.core_type = #tpu.core_type<tc>, window_params = [{transform_indices = @transform_0, window_bounds = array<i64: 256, 32>}, {pipeline_mode = #tpu.pipeline_mode<synchronous>, transform_indices = @transform_1, window_bounds = array<i64: 32, 96>}, {pipeline_mode = #tpu.pipeline_mode<synchronous>, transform_indices = @transform_2, window_bounds = array<i64: 1, 96>}, {pipeline_mode = #tpu.pipeline_mode<synchronous>, transform_indices = @transform_3, window_bounds = array<i64: 96, 32>}, {pipeline_mode = #tpu.pipeline_mode<synchronous>, transform_indices = @transform_4, window_bounds = array<i64: 1, 32>}, {transform_indices = @transform_5, window_bounds = array<i64: 256, 32>}]} {
    %c0 = arith.constant 0 : index
    %c0_0 = arith.constant 0 : index
    %0 = vector.load %arg1[%c0, %c0_0] : memref<256x32xf32, #tpu.memory_space<vmem>>, vector<256x32xf32>
    %c0_1 = arith.constant 0 : index
    %c0_2 = arith.constant 0 : index
    %1 = vector.load %arg2[%c0_1, %c0_2] : memref<32x96xf32, #tpu.memory_space<vmem>>, vector<32x96xf32>
    %cst = arith.constant dense<0.000000e+00> : vector<256x96xf32>
    %2 = tpu.matmul %0, %1, %cst {dimension_numbers = #tpu.dot_dimension_numbers<[1], [0], [0], [1], [0, 0, 1, 1], [], []>} : vector<256x32xf32>, vector<32x96xf32>, vector<256x96xf32> -> vector<256x96xf32>
    %c0_3 = arith.constant 0 : index
    %c0_4 = arith.constant 0 : index
    %3 = vector.load %arg3[%c0_3, %c0_4] : memref<1x96xf32, #tpu.memory_space<vmem>>, vector<1x96xf32>
    %4 = vector.broadcast %3 : vector<1x96xf32> to vector<256x96xf32>
    %5 = arith.addf %2, %4 : vector<256x96xf32>
    %cst_5 = arith.constant 0.000000e+00 : f32
    %6 = vector.broadcast %cst_5 : f32 to vector<256x96xf32>
    %7 = arith.maximumf %5, %6 : vector<256x96xf32>
    %c0_6 = arith.constant 0 : index
    %c0_7 = arith.constant 0 : index
    %8 = vector.load %arg4[%c0_6, %c0_7] : memref<96x32xf32, #tpu.memory_space<vmem>>, vector<96x32xf32>
    %cst_8 = arith.constant dense<0.000000e+00> : vector<256x32xf32>
    %9 = tpu.matmul %7, %8, %cst_8 {dimension_numbers = #tpu.dot_dimension_numbers<[1], [0], [0], [1], [0, 0, 1, 1], [], []>} : vector<256x96xf32>, vector<96x32xf32>, vector<256x32xf32> -> vector<256x32xf32>
    %c0_9 = arith.constant 0 : index
    %c0_10 = arith.constant 0 : index
    %10 = vector.load %arg5[%c0_9, %c0_10] : memref<1x32xf32, #tpu.memory_space<vmem>>, vector<1x32xf32>
    %11 = vector.broadcast %10 : vector<1x32xf32> to vector<256x32xf32>
    %12 = arith.addf %9, %11 : vector<256x32xf32>
    %c0_11 = arith.constant 0 : index
    %c0_12 = arith.constant 0 : index
    %13 = vector.load %arg6[%c0_11, %c0_12] : memref<256x32xf32, #tpu.memory_space<vmem>>, vector<256x32xf32>
    tpu.vector_store %arg6[%c0_11, %c0_12], %12 {strides = array<i32>} : memref<256x32xf32, #tpu.memory_space<vmem>>, vector<256x32xf32>,
    return
  }
  func.func @transform_0(%arg0: i32) -> (i32, i32) {
    %c0_i32 = arith.constant 0 : i32
    %c0_i32_0 = arith.constant 0 : i32
    return %arg0, %c0_i32 : i32, i32
  }
  func.func @transform_1(%arg0: i32) -> (i32, i32) {
    %c0_i32 = arith.constant 0 : i32
    %c0_i32_0 = arith.constant 0 : i32
    %c0_i32_1 = arith.constant 0 : i32
    return %c0_i32, %c0_i32_0 : i32, i32
  }
  func.func @transform_2(%arg0: i32) -> (i32, i32) {
    %c0_i32 = arith.constant 0 : i32
    %c0_i32_0 = arith.constant 0 : i32
    %c0_i32_1 = arith.constant 0 : i32
    return %c0_i32, %c0_i32_0 : i32, i32
  }
  func.func @transform_3(%arg0: i32) -> (i32, i32) {
    %c0_i32 = arith.constant 0 : i32
    %c0_i32_0 = arith.constant 0 : i32
    %c0_i32_1 = arith.constant 0 : i32
    return %c0_i32, %c0_i32_0 : i32, i32
  }
  func.func @transform_4(%arg0: i32) -> (i32, i32) {
    %c0_i32 = arith.constant 0 : i32
    %c0_i32_0 = arith.constant 0 : i32
    %c0_i32_1 = arith.constant 0 : i32
    return %c0_i32, %c0_i32_0 : i32, i32
  }
  func.func @transform_5(%arg0: i32) -> (i32, i32) {
    %c0_i32 = arith.constant 0 : i32
    %c0_i32_0 = arith.constant 0 : i32
    return %arg0, %c0_i32 : i32, i32
  }
}

</mosaic_0001>

<bundles_post_ra>
// kernel: tpu_custom_call.1
= control target key start
LH: loop header
LB: loop body
LE: loop exit
PB: predicated region body
PF: predicated region fallthrough
CT: control target
= control target key end

     0   :  { %s1453_s18 = smov 0   ;;  %s1455_s19 = smov 0   ;;  %s1919_s0 = inlined_call_operand.vmem [shape: f32[640,32], index: 0, kind: input, shape index: {}]   ;;  %s1920_s1 = inlined_call_operand.vmem [shape: f32[32,96], index: 1, kind: input, shape index: {}]   ;;  %s1921_s2 = inlined_call_operand.vmem [shape: f32[1,96], index: 2, kind: input, shape index: {}]   ;;  %s1922_s3 = inlined_call_operand.vmem [shape: f32[96,32], index: 3, kind: input, shape index: {}]   ;;  %s1923_s4 = inlined_call_operand.vmem [shape: f32[1,32], index: 4, kind: input, shape index: {}]   ;;  %s1924_s5 = inlined_call_operand.vmem [shape: f32[640,32], index: 5, kind: output, shape index: {}]  }
   0x1   :  { %s1457_s20 = smov 0  }
   0x2 LB: > { %s1466_s21 = sadd.s32 4294967295, %s1389_s20   ;;  %s1468_s22 = sadd.s32 1, %s1389_s20   ;;  %s1389_s20 = sphi %s1457_s20, %s1933_s20   ;;  %s1385_s19 = sphi %s1455_s19, %s1932_s19   ;;  %s1381_s18 = sphi %s1453_s18, %s1931_s18  }
   0x3   : > { %s129_s23 = ssub.s32 %s1389_s20, %s1468_s22  ;;  %s132_s24 = sadd.s32 1, %s1385_s19 }
   0x4   : > { %p130_p0 = scmp.eq.s32.totalorder %s129_s23, 0  ;;  %p142_p1 = scmp.ne.s32.totalorder %s1385_s19, %s1381_s18 }
   0x5   : > { %p143_p2 = scmp.eq.s32.totalorder %s1466_s21, 2  ;;  %p1129_p3 = scmp.ge.s32.totalorder %s1389_s20, 1 }
   0x6   : > { %s1476_s25 = scalar_select %p130_p0, %s1385_s19, %s132_s24  }
   0x7   : > { %p1478_p4 = por %p143_p2, %p142_p1  ;;  %p196_p5 = scmp.lt.s32.totalorder %s1389_s20, 4 }
   0x9   : > { %p197_p6 = pnand %p1129_p3, %p196_p5 }
   0xa   : > { %s1489_s6 = sshll.u32 (!%p197_p6), %s1466_s21, 5 }
   0xb   : > { %200 = sbr.rel (%p197_p6) target bundleno = 585 (0x249), region = 40  ;;  %p232_p7 = scmp.lt.s32.totalorder (!%p197_p6), %s1489_s6, 79 }
  0x10   : > { %v281_v0 = vld [vmem:[%s1920_s1 + $0x18] sm:$0xff]  ;;  %v280_v1 = vld [vmem:[%s1920_s1 + $0x10] sm:$0xff]  ;;  %v279_v2 = vld [vmem:[%s1920_s1 + $0x8] sm:$0xff]  ;;  %s233_s9 = scalar_select %p232_p7, %s1489_s6, 79  ;;  %vm286_vm0 = vcmask 261120   ;;  %vm544_vm1 = vcmask 785408  }
  0x11   : > { %395 = vmatpush.msra.mxu0 %v281_v0  ;;  %1217 = vmatpush.msra.mxu3 %v281_v0  ;;  %v278_v3 = vld [vmem:[%s1920_s1] sm:$0xff]  ;;  %v539_v14 = vld [vmem:[%s1922_s3 + $0x58] sm:$0xff]  ;;  %v538_v15 = vld [vmem:[%s1922_s3 + $0x50] sm:$0xff]  ;;  %s1214_s11 = sshll.u32 (%p1478_p4), %s1466_s21, 8 }
  0x12   : > { %s1132_s12 = sshll.u32 %s233_s9, 3  ;;  %645 = vmatpush.msra.mxu1 %v539_v14  ;;  %1221 = vmatpush.msra.mxu2 %v539_v14  ;;  %v537_v16 = vld [vmem:[%s1922_s3 + $0x48] sm:$0xff]  ;;  %v536_v18 = vld [vmem:[%s1922_s3 + $0x40] sm:$0xff]  ;;  %v535_v20 = vld [vmem:[%s1922_s3 + $0x38] sm:$0xff]  ;;  %s1784_s14 = scalar_lea.vmem (%p1478_p4), %s1924_s5, %s1214_s11  }
  0x13   : > { %396 = vmatpush.msra.mxu0 %v280_v1  ;;  %1218 = vmatpush.msra.mxu3 %v280_v1  ;;  %s1502_s15 = scalar_lea.vmem %s1919_s0, %s1132_s12  ;;  %v534_v21 = vld [vmem:[%s1922_s3 + $0x30] sm:$0xff]  ;;  %v533_v22 = vld [vmem:[%s1922_s3 + $0x28] sm:$0xff]  ;;  %v532_v24 = vld [vmem:[%s1922_s3 + $0x20] sm:$0xff] }
  0x14   : > { %v246_v4 = vld [vmem:[%s1502_s15] sm:$0xff]  ;;  %v247_v5 = vld [vmem:[%s1502_s15 + $0x8] sm:$0xff]  ;;  %v248_v6 = vld [vmem:[%s1502_s15 + $0x10] sm:$0xff]  ;;  %646 = vmatpush.msra.mxu1 %v538_v15  ;;  %1223 = vmatpush.msra.mxu2 %v538_v15 }
  0x15   : > { %397 = vmatpush.msra.mxu0 %v279_v2  ;;  %1219 = vmatpush.msra.mxu3 %v279_v2  ;;  %v249_v7 = vld [vmem:[%s1502_s15 + $0x18] sm:$0xff]  ;;  %v250_v8 = vld [vmem:[%s1502_s15 + $0x20] sm:$0xff]  ;;  %v251_v9 = vld [vmem:[%s1502_s15 + $0x28] sm:$0xff] }
  0x16   : > { %v252_v10 = vld [vmem:[%s1502_s15 + $0x30] sm:$0xff]  ;;  %v253_v11 = vld [vmem:[%s1502_s15 + $0x38] sm:$0xff]  ;;  %v254_v12 = vld [vmem:[%s1502_s15 + $0x40] sm:$0xff]  ;;  %647 = vmatpush.msra.mxu1 %v537_v16  ;;  %1225 = vmatpush.msra.mxu2 %v537_v16 }
  0x17   : > { %398 = vmatpush.msra.mxu0 %v278_v3  ;;  %1220 = vmatpush.msra.mxu3 %v278_v3  ;;  %v255_v13 = vld [vmem:[%s1502_s15 + $0x48] sm:$0xff]  ;;  %v256_v17 = vld [vmem:[%s1502_s15 + $0x50] sm:$0xff]  ;;  %v257_v23 = vld [vmem:[%s1502_s15 + $0x58] sm:$0xff] }
  0x18   : > { %1133 = vmatmul.msk.f32.vlgmr.msra.gmra.mxu0 %vm286_vm0, %v246_v4  ;;  %v263_v19 = vld [vmem:[%s1502_s15 + $0x88] sm:$0xff]  ;;  %648 = vmatpush.msra.mxu1 %v536_v18  ;;  %v264_v25 = vld [vmem:[%s1502_s15 + $0x90] sm:$0xff]  ;;  %v531_v26 = vld [vmem:[%s1922_s3 + $0x18] sm:$0xff] }
  0x19   : > { %1222 = vmatpush.msrb.mxu3 %v539_v14  ;;  %1227 = vmatpush.msra.mxu2 %v536_v18  ;;  %v530_v27 = vld [vmem:[%s1922_s3 + $0x10] sm:$0xff]  ;;  %v258_v28 = vld [vmem:[%s1502_s15 + $0x60] sm:$0xff]  ;;  %v529_v29 = vld [vmem:[%s1922_s3 + $0x8] sm:$0xff] }
  0x1a   : > { %1150 = vmatmul.msk.f32.vlgmr.msra.gmra.mxu3 %vm286_vm0, %v263_v19  ;;  %649 = vmatpush.msra.mxu1 %v535_v20  ;;  %v528_v30 = vld [vmem:[%s1922_s3] sm:$0xff]  ;;  %v265_v31 = vld [vmem:[%s1502_s15 + $0x98] sm:$0xff]  ;;  %v259_v32 = vld [vmem:[%s1502_s15 + $0x68] sm:$0xff] }
  0x1b   : > { %1224 = vmatpush.msrb.mxu3 %v538_v15  ;;  %1229 = vmatpush.msra.mxu2 %v535_v20  ;;  %v266_v33 = vld [vmem:[%s1502_s15 + $0xa0] sm:$0xff]  ;;  %v260_v34 = vld [vmem:[%s1502_s15 + $0x70] sm:$0xff]  ;;  %v267_v35 = vld [vmem:[%s1502_s15 + $0xa8] sm:$0xff] }
  0x1c   : > { %650 = vmatpush.msra.mxu1 %v534_v21  ;;  %v261_v36 = vld [vmem:[%s1502_s15 + $0x78] sm:$0xff]  ;;  %v268_v37 = vld [vmem:[%s1502_s15 + $0xb0] sm:$0xff]  ;;  %v1587_v38 = vld [vmem:[%s1921_s2] ss:$0 sm:$0xff] }
  0x1d   : > { %1226 = vmatpush.msrb.mxu3 %v537_v16  ;;  %1231 = vmatpush.msra.mxu2 %v534_v21  ;;  %v262_v40 = vld [vmem:[%s1502_s15 + $0x80] sm:$0xff]  ;;  %v269_v43 = vld [vmem:[%s1502_s15 + $0xb8] sm:$0xff]  ;;  %v271_v51 = vld [vmem:[%s1502_s15 + $0xc8] sm:$0xff] }
  0x1e   : > { %651 = vmatpush.msra.mxu1 %v533_v22  ;;  %v270_v47 = vld [vmem:[%s1502_s15 + $0xc0] sm:$0xff]  ;;  %v272_v55 = vld [vmem:[%s1502_s15 + $0xd0] sm:$0xff]  ;;  %v273_v59 = vld [vmem:[%s1502_s15 + $0xd8] sm:$0xff] }
  0x1f   : > { %1228 = vmatpush.msrb.mxu3 %v536_v18  ;;  %1233 = vmatpush.msra.mxu2 %v533_v22  ;;  %v274_v63 = vld [vmem:[%s1502_s15 + $0xe0] sm:$0xff]  ;;  %v275_v3 = vld [vmem:[%s1502_s15 + $0xe8] sm:$0xff] }
  0x20   : > { %1134 = vmatmul.msk.f32.gmra.mxu0 %vm286_vm0, %v247_v5  ;;  %652 = vmatpush.msra.mxu1 %v532_v24 }
  0x21   : > { %1230 = vmatpush.msrb.mxu3 %v535_v20  ;;  %1235 = vmatpush.msra.mxu2 %v532_v24 }
  0x22   : > { %1151 = vmatmul.msk.f32.gmra.mxu3 %vm286_vm0, %v264_v25  ;;  %653 = vmatpush.msra.mxu1 %v531_v26 }
  0x23   : > { %1232 = vmatpush.msrb.mxu3 %v534_v21  ;;  %1237 = vmatpush.msra.mxu2 %v531_v26 }
  0x24   : > { %654 = vmatpush.msra.mxu1 %v530_v27 }
  0x25   : > { %1234 = vmatpush.msrb.mxu3 %v533_v22  ;;  %1239 = vmatpush.msra.mxu2 %v530_v27 }
  0x26   : > { %655 = vmatpush.msra.mxu1 %v529_v29 }
  0x27   : > { %1236 = vmatpush.msrb.mxu3 %v532_v24  ;;  %1241 = vmatpush.msra.mxu2 %v529_v29 }
  0x28   : > { %1135 = vmatmul.msk.f32.gmra.mxu0 %vm286_vm0, %v248_v6  ;;  %656 = vmatpush.msra.mxu1 %v528_v30 }
  0x29   : > { %1238 = vmatpush.msrb.mxu3 %v531_v26  ;;  %1243 = vmatpush.msra.mxu2 %v528_v30 }
  0x2a   : > { %1152 = vmatmul.msk.f32.gmra.mxu3 %vm286_vm0, %v265_v31 }
  0x2b   : > { %1240 = vmatpush.msrb.mxu3 %v530_v27 }
  0x2d   : > { %1242 = vmatpush.msrb.mxu3 %v529_v29 }
  0x2f   : > { %1244 = vmatpush.msrb.mxu3 %v528_v30 }
  0x30   : > { %1136 = vmatmul.msk.f32.gmra.mxu0 %vm286_vm0, %v249_v7  ;;  %v276_v7 = vld [vmem:[%s1502_s15 + $0xf0] sm:$0xff] }
  0x32   : > { %1153 = vmatmul.msk.f32.gmra.mxu3 %vm286_vm0, %v266_v33 }
  0x38   : > { %1137 = vmatmul.msk.f32.gmra.mxu0 %vm286_vm0, %v250_v8 }
  0x3a   : > { %1154 = vmatmul.msk.f32.gmra.mxu3 %vm286_vm0, %v267_v35 }
  0x40   : > { %1138 = vmatmul.msk.f32.gmra.mxu0 %vm286_vm0, %v251_v9 }
  0x42   : > { %1155 = vmatmul.msk.f32.gmra.mxu3 %vm286_vm0, %v268_v37 }
  0x48   : > { %1139 = vmatmul.msk.f32.gmra.mxu0 %vm286_vm0, %v252_v10 }
  0x4a   : > { %1156 = vmatmul.msk.f32.gmra.mxu3 %vm286_vm0, %v269_v43 }
  0x50   : > { %1140 = vmatmul.msk.f32.gmra.mxu0 %vm286_vm0, %v253_v11  ;;  %v277_v11 = vld [vmem:[%s1502_s15 + $0xf8] sm:$0xff]  ;;  %s224_s15 = sand.u32 1, %s1381_s18   ;;  %s794_s18 = ssub.s32 (%p1478_p4), 80, %s1489_s6 }
  0x51   : > { %s1130_s7 = sshll.u32 %s224_s15, 8  ;;  %p795_p8 = scmp.lt.s32.totalorder (%p1478_p4), %s794_s18, 32 }
  0x52   : > { %1157 = vmatmul.msk.f32.gmra.mxu3 %vm286_vm0, %v270_v47  ;;  %s1649_s10 = scalar_lea.vmem [#allocation2], %s1130_s7  }
  0x58   : > { %1141 = vmatmul.msk.f32.gmra.mxu0 %vm286_vm0, %v254_v12 }
  0x5a   : > { %1158 = vmatmul.msk.f32.gmra.mxu3 %vm286_vm0, %v271_v51 }
  0x60   : > { %1142 = vmatmul.msk.f32.gmra.mxu0 %vm286_vm0, %v255_v13 }
  0x62   : > { %1159 = vmatmul.msk.f32.gmra.mxu3 %vm286_vm0, %v272_v55 }
  0x68   : > { %1143 = vmatmul.msk.f32.gmra.mxu0 %vm286_vm0, %v256_v17 }
  0x6a   : > { %1160 = vmatmul.msk.f32.gmra.mxu3 %vm286_vm0, %v273_v59 }
  0x70   : > { %1144 = vmatmul.msk.f32.gmra.mxu0 %vm286_vm0, %v257_v23 }
  0x72   : > { %1161 = vmatmul.msk.f32.gmra.mxu3 %vm286_vm0, %v274_v63 }
  0x78   : > { %1145 = vmatmul.msk.f32.gmra.mxu0 %vm286_vm0, %v258_v28 }
  0x7a   : > { %1162 = vmatmul.msk.f32.gmra.mxu3 %vm286_vm0, %v275_v3 }
  0x80   : > { %1146 = vmatmul.msk.f32.gmra.mxu0 %vm286_vm0, %v259_v32 }
  0x82   : > { %1163 = vmatmul.msk.f32.gmra.mxu3 %vm286_vm0, %v276_v7 }
  0x88   : > { %1147 = vmatmul.msk.f32.gmra.mxu0 %vm286_vm0, %v260_v34 }
  0x8a   : > { %1164 = vmatmul.msk.f32.gmra.mxu3 %vm286_vm0, %v277_v11 }
  0x90   : > { %1148 = vmatmul.msk.f32.gmra.mxu0 %vm286_vm0, %v261_v36 }
  0x95   : > { %v400_v39 = vpop.f32.mrf.mxu0 }
  0x96   : > { %v401_v41 = vadd.f32 %v1587_v38, %v400_v39  ;;  %v1645_v39 = vld [vmem:[%s1923_s4] ss:$0 sm:$0xff] }
  0x98   : > { %v496_v42 = vmax.f32 %v401_v41, 0.0  ;;  %1149 = vmatmul.msk.f32.gmra.mxu0 %vm286_vm0, %v262_v40 }
  0x9a   : > { %1165 = vmatmul.msk.f32.vlgmr.msra.gmra.mxu1 %vm544_vm1, %v496_v42 }
  0x9d   : > { %v403_v44 = vpop.f32.mrf.mxu0  ;;  %v451_v19 = vpop.f32.mrf.mxu3 }
  0x9e   : > { %v404_v45 = vadd.f32 %v1587_v38, %v403_v44 }
  0xa0   : > { %v497_v46 = vmax.f32 %v404_v45, 0.0 }
  0xa2   : > { %1166 = vmatmul.msk.f32.gmra.mxu1 %vm544_vm1, %v497_v46  ;;  %v452_v46 = vadd.f32 %v1587_v38, %v451_v19 }
  0xa5   : > { %v406_v48 = vpop.f32.mrf.mxu0  ;;  %v454_v23 = vpop.f32.mrf.mxu3 }
  0xa6   : > { %v407_v49 = vadd.f32 %v1587_v38, %v406_v48  ;;  %v455_v51 = vadd.f32 %v1587_v38, %v454_v23 }
  0xa8   : > { %v498_v50 = vmax.f32 %v407_v49, 0.0  ;;  %v513_v49 = vmax.f32 %v452_v46, 0.0 }
  0xaa   : > { %1167 = vmatmul.msk.f32.gmra.mxu1 %vm544_vm1, %v498_v50 }
  0xad   : > { %v409_v52 = vpop.f32.mrf.mxu0  ;;  %v457_v27 = vpop.f32.mrf.mxu3 }
  0xae   : > { %v410_v53 = vadd.f32 %v1587_v38, %v409_v52 }
  0xb0   : > { %v499_v54 = vmax.f32 %v410_v53, 0.0 }
  0xb2   : > { %1168 = vmatmul.msk.f32.gmra.mxu1 %vm544_vm1, %v499_v54  ;;  %v514_v54 = vmax.f32 %v455_v51, 0.0 }
  0xb5   : > { %v412_v56 = vpop.f32.mrf.mxu0  ;;  %v460_v31 = vpop.f32.mrf.mxu3 }
  0xb6   : > { %v413_v57 = vadd.f32 %v1587_v38, %v412_v56  ;;  %v458_v56 = vadd.f32 %v1587_v38, %v457_v27 }
  0xb8   : > { %v500_v58 = vmax.f32 %v413_v57, 0.0  ;;  %v515_v59 = vmax.f32 %v458_v56, 0.0 }
  0xba   : > { %1169 = vmatmul.msk.f32.gmra.mxu1 %vm544_vm1, %v500_v58 }
  0xbd   : > { %v415_v60 = vpop.f32.mrf.mxu0  ;;  %v463_v35 = vpop.f32.mrf.mxu3 }
  0xbe   : > { %v416_v61 = vadd.f32 %v1587_v38, %v415_v60 }
  0xc0   : > { %v501_v62 = vmax.f32 %v416_v61, 0.0  ;;  %v461_v61 = vadd.f32 %v1587_v38, %v460_v31 }
  0xc2   : > { %1170 = vmatmul.msk.f32.gmra.mxu1 %vm544_vm1, %v501_v62 }
  0xc5   : > { %v418_v0 = vpop.f32.mrf.mxu0  ;;  %v466_v41 = vpop.f32.mrf.mxu3 }
  0xc6   : > { %v419_v1 = vadd.f32 %v1587_v38, %v418_v0  ;;  %v516_v0 = vmax.f32 %v461_v61, 0.0  ;;  %v467_v7 = vadd.f32 %v1587_v38, %v466_v41 }
  0xc8   : > { %v502_v2 = vmax.f32 %v419_v1, 0.0 }
  0xca   : > { %1171 = vmatmul.msk.f32.gmra.mxu1 %vm544_vm1, %v502_v2  ;;  %v464_v2 = vadd.f32 %v1587_v38, %v463_v35 }
  0xcd   : > { %v421_v4 = vpop.f32.mrf.mxu0  ;;  %v469_v47 = vpop.f32.mrf.mxu3 }
  0xce   : > { %v422_v5 = vadd.f32 %v1587_v38, %v421_v4 }
  0xd0   : > { %v503_v6 = vmax.f32 %v422_v5, 0.0  ;;  %v517_v5 = vmax.f32 %v464_v2, 0.0 }
  0xd2   : > { %1172 = vmatmul.msk.f32.gmra.mxu1 %vm544_vm1, %v503_v6 }
  0xd5   : > { %v424_v8 = vpop.f32.mrf.mxu0  ;;  %v472_v52 = vpop.f32.mrf.mxu3 }
  0xd6   : > { %v425_v9 = vadd.f32 %v1587_v38, %v424_v8 }
  0xd8   : > { %v504_v10 = vmax.f32 %v425_v9, 0.0 }
  0xda   : > { %1173 = vmatmul.msk.f32.gmra.mxu1 %vm544_vm1, %v504_v10  ;;  %v518_v10 = vmax.f32 %v467_v7, 0.0 }
  0xdd   : > { %v427_v12 = vpop.f32.mrf.mxu0  ;;  %v475_v57 = vpop.f32.mrf.mxu3 }
  0xde   : > { %v428_v13 = vadd.f32 %v1587_v38, %v427_v12  ;;  %v470_v12 = vadd.f32 %v1587_v38, %v469_v47 }
  0xe0   : > { %v505_v14 = vmax.f32 %v428_v13, 0.0 }
  0xe2   : > { %1174 = vmatmul.msk.f32.gmra.mxu1 %vm544_vm1, %v505_v14 }
  0xe5   : > { %v430_v15 = vpop.f32.mrf.mxu0  ;;  %v478_v62 = vpop.f32.mrf.mxu3 }
  0xe6   : > { %v431_v16 = vadd.f32 %v1587_v38, %v430_v15  ;;  %v519_v15 = vmax.f32 %v470_v12, 0.0  ;;  %v479_v31 = vadd.f32 %v1587_v38, %v478_v62 }
  0xe8   : > { %v506_v17 = vmax.f32 %v431_v16, 0.0 }
  0xea   : > { %1175 = vmatmul.msk.f32.gmra.mxu1 %vm544_vm1, %v506_v17  ;;  %v473_v17 = vadd.f32 %v1587_v38, %v472_v52 }
  0xed   : > { %v433_v18 = vpop.f32.mrf.mxu0  ;;  %v481_v3 = vpop.f32.mrf.mxu3 }
  0xee   : > { %v434_v20 = vadd.f32 %v1587_v38, %v433_v18  ;;  %v482_v35 = vadd.f32 %v1587_v38, %v481_v3 }
  0xf0   : > { %v507_v21 = vmax.f32 %v434_v20, 0.0 }
  0xf2   : > { %1176 = vmatmul.msk.f32.gmra.mxu1 %vm544_vm1, %v507_v21  ;;  %v520_v21 = vmax.f32 %v473_v17, 0.0 }
  0xf5   : > { %v436_v22 = vpop.f32.mrf.mxu0  ;;  %v484_v8 = vpop.f32.mrf.mxu3 }
  0xf6   : > { %v437_v24 = vadd.f32 %v1587_v38, %v436_v22  ;;  %v485_v41 = vadd.f32 %v1587_v38, %v484_v8 }
  0xf8   : > { %v508_v25 = vmax.f32 %v437_v24, 0.0  ;;  %v476_v24 = vadd.f32 %v1587_v38, %v475_v57 }
  0xfa   : > { %1177 = vmatmul.msk.f32.gmra.mxu1 %vm544_vm1, %v508_v25 }
  0xfd   : > { %v439_v26 = vpop.f32.mrf.mxu0  ;;  %v487_v13 = vpop.f32.mrf.mxu3 }
  0xfe   : > { %v440_v28 = vadd.f32 %v1587_v38, %v439_v26 }
 0x100   : > { %v509_v29 = vmax.f32 %v440_v28, 0.0  ;;  %v521_v28 = vmax.f32 %v476_v24, 0.0 }
 0x102   : > { %1178 = vmatmul.msk.f32.gmra.mxu1 %vm544_vm1, %v509_v29 }
 0x105   : > { %v442_v30 = vpop.f32.mrf.mxu0  ;;  %v490_v18 = vpop.f32.mrf.mxu3 }
 0x106   : > { %v443_v32 = vadd.f32 %v1587_v38, %v442_v30  ;;  %v491_v19 = vadd.f32 %v1587_v38, %v490_v18 }
 0x108   : > { %v510_v33 = vmax.f32 %v443_v32, 0.0  ;;  %v526_v23 = vmax.f32 %v491_v19, 0.0 }
 0x10a   : > { %1179 = vmatmul.msk.f32.gmra.mxu1 %vm544_vm1, %v510_v33  ;;  %1195 = vmatmul.msk.f32.vlgmr.msrb.gmra.mxu3 %vm544_vm1, %v526_v23  ;;  %v522_v33 = vmax.f32 %v479_v31, 0.0 }
 0x10d   : > { %v445_v34 = vpop.f32.mrf.mxu0  ;;  %v493_v25 = vpop.f32.mrf.mxu3 }
 0x10e   : > { %v446_v36 = vadd.f32 %v1587_v38, %v445_v34  ;;  %v494_v26 = vadd.f32 %v1587_v38, %v493_v25 }
 0x110   : > { %v511_v37 = vmax.f32 %v446_v36, 0.0  ;;  %v527_v30 = vmax.f32 %v494_v26, 0.0 }
 0x112   : > { %1180 = vmatmul.msk.f32.vlgmr.msra.gmra.mxu2 %vm544_vm1, %v511_v37  ;;  %1196 = vmatmul.msk.f32.gmra.mxu3 %vm544_vm1, %v527_v30  ;;  %v523_v37 = vmax.f32 %v482_v35, 0.0 }
 0x115   : > { %v448_v40 = vpop.f32.mrf.mxu0 }
 0x116   : > { %v449_v42 = vadd.f32 %v1587_v38, %v448_v40 }
 0x117   : > { %v658_v43 = vpop.f32.mrf.mxu1 }
 0x118   : > { %v512_v44 = vmax.f32 %v449_v42, 0.0  ;;  %v659_v45 = vadd.f32 %v1645_v39, %v658_v43  ;;  %v524_v43 = vmax.f32 %v485_v41, 0.0 }
 0x11a   : > { %754 = vst.msk [vmem:[%s1649_s10] sm:$0xff] %vm286_vm0, %v659_v45  ;;  %1181 = vmatmul.msk.f32.gmra.mxu2 %vm544_vm1, %v512_v44  ;;  %v488_v45 = vadd.f32 %v1587_v38, %v487_v13 }
 0x11c   : > { %v525_v47 = vmax.f32 %v488_v45, 0.0 }
 0x11f   : > { %v661_v48 = vpop.f32.mrf.mxu1 }
 0x120   : > { %v662_v50 = vadd.f32 %v1645_v39, %v661_v48 }
 0x122   : > { %755 = vst.msk [vmem:[%s1649_s10 + $0x8] sm:$0xff] %vm286_vm0, %v662_v50  ;;  %1182 = vmatmul.msk.f32.gmra.mxu2 %vm544_vm1, %v513_v49 }
 0x127   : > { %v664_v53 = vpop.f32.mrf.mxu1 }
 0x128   : > { %v665_v55 = vadd.f32 %v1645_v39, %v664_v53 }
 0x12a   : > { %756 = vst.msk [vmem:[%s1649_s10 + $0x10] sm:$0xff] %vm286_vm0, %v665_v55  ;;  %1183 = vmatmul.msk.f32.gmra.mxu2 %vm544_vm1, %v514_v54 }
 0x12f   : > { %v667_v58 = vpop.f32.mrf.mxu1 }
 0x130   : > { %v668_v60 = vadd.f32 %v1645_v39, %v667_v58 }
 0x132   : > { %757 = vst.msk [vmem:[%s1649_s10 + $0x18] sm:$0xff] %vm286_vm0, %v668_v60  ;;  %1184 = vmatmul.msk.f32.gmra.mxu2 %vm544_vm1, %v515_v59 }
 0x137   : > { %v670_v63 = vpop.f32.mrf.mxu1 }
 0x138   : > { %v671_v1 = vadd.f32 %v1645_v39, %v670_v63 }
 0x13a   : > { %758 = vst.msk [vmem:[%s1649_s10 + $0x20] sm:$0xff] %vm286_vm0, %v671_v1  ;;  %1185 = vmatmul.msk.f32.gmra.mxu2 %vm544_vm1, %v516_v0 }
 0x13f   : > { %v673_v4 = vpop.f32.mrf.mxu1 }
 0x140   : > { %v674_v6 = vadd.f32 %v1645_v39, %v673_v4 }
 0x142   : > { %759 = vst.msk [vmem:[%s1649_s10 + $0x28] sm:$0xff] %vm286_vm0, %v674_v6  ;;  %1186 = vmatmul.msk.f32.gmra.mxu2 %vm544_vm1, %v517_v5 }
 0x147   : > { %v676_v9 = vpop.f32.mrf.mxu1 }
 0x148   : > { %v677_v11 = vadd.f32 %v1645_v39, %v676_v9 }
 0x14a   : > { %760 = vst.msk [vmem:[%s1649_s10 + $0x30] sm:$0xff] %vm286_vm0, %v677_v11  ;;  %1187 = vmatmul.msk.f32.gmra.mxu2 %vm544_vm1, %v518_v10 }
 0x14f   : > { %v679_v14 = vpop.f32.mrf.mxu1 }
 0x150   : > { %v680_v16 = vadd.f32 %v1645_v39, %v679_v14 }
 0x152   : > { %761 = vst.msk [vmem:[%s1649_s10 + $0x38] sm:$0xff] %vm286_vm0, %v680_v16  ;;  %1188 = vmatmul.msk.f32.gmra.mxu2 %vm544_vm1, %v519_v15 }
 0x157   : > { %v682_v20 = vpop.f32.mrf.mxu1 }
 0x158   : > { %v683_v22 = vadd.f32 %v1645_v39, %v682_v20 }
 0x15a   : > { %762 = vst.msk [vmem:[%s1649_s10 + $0x40] sm:$0xff] %vm286_vm0, %v683_v22  ;;  %1189 = vmatmul.msk.f32.gmra.mxu2 %vm544_vm1, %v520_v21 }
 0x15f   : > { %v685_v27 = vpop.f32.mrf.mxu1 }
 0x160   : > { %v686_v29 = vadd.f32 %v1645_v39, %v685_v27 }
 0x162   : > { %763 = vst.msk [vmem:[%s1649_s10 + $0x48] sm:$0xff] %vm286_vm0, %v686_v29  ;;  %1190 = vmatmul.msk.f32.gmra.mxu2 %vm544_vm1, %v521_v28 }
 0x167   : > { %v688_v32 = vpop.f32.mrf.mxu1 }
 0x168   : > { %v689_v34 = vadd.f32 %v1645_v39, %v688_v32 }
 0x16a   : > { %764 = vst.msk [vmem:[%s1649_s10 + $0x50] sm:$0xff] %vm286_vm0, %v689_v34  ;;  %1191 = vmatmul.msk.f32.gmra.mxu2 %vm544_vm1, %v522_v33 }
 0x16f   : > { %v691_v36 = vpop.f32.mrf.mxu1 }
 0x170   : > { %v692_v40 = vadd.f32 %v1645_v39, %v691_v36 }
 0x172   : > { %765 = vst.msk [vmem:[%s1649_s10 + $0x58] sm:$0xff] %vm286_vm0, %v692_v40  ;;  %1192 = vmatmul.msk.f32.gmra.mxu2 %vm544_vm1, %v523_v37 }
 0x177   : > { %v694_v42 = vpop.f32.mrf.mxu1 }
 0x178   : > { %v695_v44 = vadd.f32 %v1645_v39, %v694_v42 }
 0x17a   : > { %766 = vst.msk [vmem:[%s1649_s10 + $0x60] sm:$0xff] %vm286_vm0, %v695_v44  ;;  %1193 = vmatmul.msk.f32.gmra.mxu2 %vm544_vm1, %v524_v43 }
 0x17f   : > { %v697_v46 = vpop.f32.mrf.mxu1 }
 0x180   : > { %v698_v48 = vadd.f32 %v1645_v39, %v697_v46 }
 0x182   : > { %767 = vst.msk [vmem:[%s1649_s10 + $0x68] sm:$0xff] %vm286_vm0, %v698_v48  ;;  %1194 = vmatmul.msk.f32.gmra.mxu2 %vm544_vm1, %v525_v47 }
 0x187   : > { %v700_v49 = vpop.f32.mrf.mxu1 }
 0x188   : > { %v701_v50 = vadd.f32 %v1645_v39, %v700_v49 }
 0x18a   : > { %768 = vst.msk [vmem:[%s1649_s10 + $0x70] sm:$0xff] %vm286_vm0, %v701_v50 }
 0x18d   : > { %v748_v5 = vpop.f32.mrf.mxu3 }
 0x18e   : > { %v749_v7 = vadd.f32 %v1645_v39, %v748_v5 }
 0x190   : > { %784 = vst.msk [vmem:[%s1649_s10 + $0xf0] sm:$0xff] %vm286_vm0, %v749_v7 }
 0x195   : > { %v703_v51 = vpop.f32.mrf.mxu2  ;;  %v751_v9 = vpop.f32.mrf.mxu3 }
 0x196   : > { %v704_v52 = vadd.f32 %v1645_v39, %v703_v51  ;;  %v752_v11 = vadd.f32 %v1645_v39, %v751_v9 }
 0x198   : > { %769 = vst.msk [vmem:[%s1649_s10 + $0x78] sm:$0xff] %vm286_vm0, %v704_v52 }
 0x199   : > { %785 = vst.msk [vmem:[%s1649_s10 + $0xf8] sm:$0xff] %vm286_vm0, %v752_v11 }
 0x19d   : > { %v706_v38 = vpop.f32.mrf.mxu2 }
 0x19e   : > { %v707_v53 = vadd.f32 %v1645_v39, %v706_v38 }
 0x1a0   : > { %770 = vst.msk [vmem:[%s1649_s10 + $0x80] sm:$0xff] %vm286_vm0, %v707_v53 }
 0x1a5   : > { %v709_v54 = vpop.f32.mrf.mxu2 }
 0x1a6   : > { %v710_v55 = vadd.f32 %v1645_v39, %v709_v54 }
 0x1a8   : > { %771 = vst.msk [vmem:[%s1649_s10 + $0x88] sm:$0xff] %vm286_vm0, %v710_v55 }
 0x1ad   : > { %v712_v56 = vpop.f32.mrf.mxu2 }
 0x1ae   : > { %v713_v57 = vadd.f32 %v1645_v39, %v712_v56 }
 0x1b0   : > { %772 = vst.msk [vmem:[%s1649_s10 + $0x90] sm:$0xff] %vm286_vm0, %v713_v57 }
 0x1b5   : > { %v715_v58 = vpop.f32.mrf.mxu2 }
 0x1b6   : > { %v716_v59 = vadd.f32 %v1645_v39, %v715_v58 }
 0x1b8   : > { %773 = vst.msk [vmem:[%s1649_s10 + $0x98] sm:$0xff] %vm286_vm0, %v716_v59 }
 0x1bd   : > { %v718_v60 = vpop.f32.mrf.mxu2 }
 0x1be   : > { %v719_v61 = vadd.f32 %v1645_v39, %v718_v60 }
 0x1c0   : > { %774 = vst.msk [vmem:[%s1649_s10 + $0xa0] sm:$0xff] %vm286_vm0, %v719_v61 }
 0x1c5   : > { %v721_v62 = vpop.f32.mrf.mxu2 }
 0x1c6   : > { %v722_v63 = vadd.f32 %v1645_v39, %v721_v62 }
 0x1c8   : > { %775 = vst.msk [vmem:[%s1649_s10 + $0xa8] sm:$0xff] %vm286_vm0, %v722_v63 }
 0x1cd   : > { %v724_v0 = vpop.f32.mrf.mxu2 }
 0x1ce   : > { %v725_v1 = vadd.f32 %v1645_v39, %v724_v0 }
 0x1d0   : > { %776 = vst.msk [vmem:[%s1649_s10 + $0xb0] sm:$0xff] %vm286_vm0, %v725_v1 }
 0x1d5   : > { %v727_v2 = vpop.f32.mrf.mxu2 }
 0x1d6   : > { %v728_v3 = vadd.f32 %v1645_v39, %v727_v2 }
 0x1d8   : > { %777 = vst.msk [vmem:[%s1649_s10 + $0xb8] sm:$0xff] %vm286_vm0, %v728_v3 }
 0x1dd   : > { %v730_v4 = vpop.f32.mrf.mxu2 }
 0x1de   : > { %v731_v6 = vadd.f32 %v1645_v39, %v730_v4 }
 0x1e0   : > { %778 = vst.msk [vmem:[%s1649_s10 + $0xc0] sm:$0xff] %vm286_vm0, %v731_v6 }
 0x1e5   : > { %v733_v8 = vpop.f32.mrf.mxu2 }
 0x1e6   : > { %v734_v10 = vadd.f32 %v1645_v39, %v733_v8 }
 0x1e8   : > { %779 = vst.msk [vmem:[%s1649_s10 + $0xc8] sm:$0xff] %vm286_vm0, %v734_v10 }
 0x1ed   : > { %v736_v12 = vpop.f32.mrf.mxu2 }
 0x1ee   : > { %v737_v13 = vadd.f32 %v1645_v39, %v736_v12 }
 0x1f0   : > { %780 = vst.msk [vmem:[%s1649_s10 + $0xd0] sm:$0xff] %vm286_vm0, %v737_v13 }
 0x1f5   : > { %v739_v14 = vpop.f32.mrf.mxu2 }
 0x1f6   : > { %v740_v15 = vadd.f32 %v1645_v39, %v739_v14 }
 0x1f8   : > { %781 = vst.msk [vmem:[%s1649_s10 + $0xd8] sm:$0xff] %vm286_vm0, %v740_v15 }
 0x1fd   : > { %v742_v16 = vpop.f32.mrf.mxu2 }
 0x1fe   : > { %v743_v17 = vadd.f32 %v1645_v39, %v742_v16 }
 0x200   : > { %782 = vst.msk [vmem:[%s1649_s10 + $0xe0] sm:$0xff] %vm286_vm0, %v743_v17 }
 0x204   : > { %792 = sbr.rel (!%p1478_p4) target bundleno = 585 (0x249), region = 44 }
 0x205   : > { %v745_v18 = vpop.f32.mrf.mxu2 }
 0x206   : > { %v746_v19 = vadd.f32 %v1645_v39, %v745_v18 }
 0x208   : > { %783 = vst.msk [vmem:[%s1649_s10 + $0xe8] sm:$0xff] %vm286_vm0, %v746_v19 }
 0x209   : > { %s1935_s18 = smov (!%p795_p8, %s794_s18), 32 }
 0x20a   : > { %s1199_s16 = sshll.u32 %s1935_s18, 3 }
 0x20b   : > { %p1202_p9 = scmp.eq.s32.totalorder %s1199_s16, 0 }
 0x20c   : > { %s1790_s17 = sshrl.u32 (!%p1202_p9), %s1935_s18, 5 }
 0x20d   : > { %803 = sbr.rel (%p1202_p9) target bundleno = 585 (0x249), region = 48  ;;  %p1203_p10 = scmp.le.s32.totalorder (!%p1202_p9), %s1790_s17, 0 }
 0x212   : > { %1082 = sbr.rel (%p1203_p10) target bundleno = 568 (0x238), region = 124  ;;  %s1926_s21 = smov (!%p1203_p10), %s1784_s14 }
 0x213   : > { %s1927_s26 = smov (!%p1203_p10), %s1649_s10  ;;  %s1799_s6 = smov (!%p1203_p10), 0  }
 0x214   : > { %s1801_s20 = smov (!%p1203_p10), 0  }
 0x217 LB: >> { %v928_v39 = vld [vmem:[%s1397_s26] sm:$0xff]  ;;  %v930_v20 = vld [vmem:[%s1397_s26 + $0x8] sm:$0xff]  ;;  %v932_v21 = vld [vmem:[%s1397_s26 + $0x10] sm:$0xff]  ;;  %s992_s23 = sadd.s32 1, %s1401_s6  ;;  %s922_s20 = sadd.s32 1, %s1405_s20   ;;  %s1405_s20 = sphi %s1801_s20, %s922_s20   ;;  %s1401_s6 = sphi %s1799_s6, %s1930_s6   ;;  %s1397_s26 = sphi %s1927_s26, %s1929_s26   ;;  %s1393_s21 = sphi %s1926_s21, %s1928_s21  }
 0x218   : >> { %929 = vst [vmem:[%s1393_s21] sm:$0xff] %v928_v39  ;;  %v934_v22 = vld [vmem:[%s1397_s26 + $0x18] sm:$0xff]  ;;  %p993_p11 = scmp.ge.s32.totalorder %s992_s23, %s1790_s17  ;;  %v936_v23 = vld [vmem:[%s1397_s26 + $0x20] sm:$0xff]  ;;  %v938_v24 = vld [vmem:[%s1397_s26 + $0x28] sm:$0xff]  ;;  %p921_p12 = scmp.ge.s32.totalorder %s922_s20, %s1790_s17 }
 0x219   : >> { %931 = vst [vmem:[%s1393_s21 + $0x8] sm:$0xff] %v930_v20  ;;  %v940_v25 = vld [vmem:[%s1397_s26 + $0x30] sm:$0xff]  ;;  %v942_v26 = vld [vmem:[%s1397_s26 + $0x38] sm:$0xff]  ;;  %v944_v27 = vld [vmem:[%s1397_s26 + $0x40] sm:$0xff] }
 0x21a   : >> { %933 = vst [vmem:[%s1393_s21 + $0x10] sm:$0xff] %v932_v21  ;;  %s1937_s23 = smov (%p993_p11, %s992_s23), 0  ;;  %v946_v28 = vld [vmem:[%s1397_s26 + $0x48] sm:$0xff]  ;;  %v948_v29 = vld [vmem:[%s1397_s26 + $0x50] sm:$0xff]  ;;  %v950_v30 = vld [vmem:[%s1397_s26 + $0x58] sm:$0xff] }
 0x21b   : >> { %935 = vst [vmem:[%s1393_s21 + $0x18] sm:$0xff] %v934_v22  ;;  %s1204_s24 = sshll.u32 %s1937_s23, 8  ;;  %v952_v31 = vld [vmem:[%s1397_s26 + $0x60] sm:$0xff]  ;;  %v954_v32 = vld [vmem:[%s1397_s26 + $0x68] sm:$0xff]  ;;  %v956_v33 = vld [vmem:[%s1397_s26 + $0x70] sm:$0xff]  ;;  %s1930_s6 = smov %s1937_s23 }
 0x21c   : >> { %937 = vst [vmem:[%s1393_s21 + $0x20] sm:$0xff] %v936_v23  ;;  %s1833_s27 = scalar_lea.vmem %s1649_s10, %s1204_s24 [#allocation2]   ;;  %s1836_s28 = scalar_lea.vmem %s1784_s14, %s1204_s24   ;;  %v958_v34 = vld [vmem:[%s1397_s26 + $0x78] sm:$0xff]  ;;  %v960_v35 = vld [vmem:[%s1397_s26 + $0x80] sm:$0xff]  ;;  %v962_v36 = vld [vmem:[%s1397_s26 + $0x88] sm:$0xff] }
 0x21d   : >> { %939 = vst [vmem:[%s1393_s21 + $0x28] sm:$0xff] %v938_v24  ;;  %v964_v37 = vld [vmem:[%s1397_s26 + $0x90] sm:$0xff]  ;;  %v966_v40 = vld [vmem:[%s1397_s26 + $0x98] sm:$0xff]  ;;  %v968_v41 = vld [vmem:[%s1397_s26 + $0xa0] sm:$0xff] }
 0x21e   : >> { %941 = vst [vmem:[%s1393_s21 + $0x30] sm:$0xff] %v940_v25  ;;  %v970_v42 = vld [vmem:[%s1397_s26 + $0xa8] sm:$0xff]  ;;  %v972_v43 = vld [vmem:[%s1397_s26 + $0xb0] sm:$0xff]  ;;  %v974_v44 = vld [vmem:[%s1397_s26 + $0xb8] sm:$0xff] }
 0x21f   : >> { %943 = vst [vmem:[%s1393_s21 + $0x38] sm:$0xff] %v942_v26  ;;  %v976_v45 = vld [vmem:[%s1397_s26 + $0xc0] sm:$0xff]  ;;  %v978_v46 = vld [vmem:[%s1397_s26 + $0xc8] sm:$0xff]  ;;  %v980_v47 = vld [vmem:[%s1397_s26 + $0xd0] sm:$0xff] }
 0x220   : >> { %945 = vst [vmem:[%s1393_s21 + $0x40] sm:$0xff] %v944_v27  ;;  %v982_v48 = vld [vmem:[%s1397_s26 + $0xd8] sm:$0xff]  ;;  %v984_v49 = vld [vmem:[%s1397_s26 + $0xe0] sm:$0xff]  ;;  %v986_v50 = vld [vmem:[%s1397_s26 + $0xe8] sm:$0xff] }
 0x221   : >> { %947 = vst [vmem:[%s1393_s21 + $0x48] sm:$0xff] %v946_v28  ;;  %v988_v51 = vld [vmem:[%s1397_s26 + $0xf0] sm:$0xff]  ;;  %v990_v52 = vld [vmem:[%s1397_s26 + $0xf8] sm:$0xff]  ;;  %s1929_s26 = smov %s1833_s27 }
 0x222   : >> { %949 = vst [vmem:[%s1393_s21 + $0x50] sm:$0xff] %v948_v29 }
 0x223   : >> { %951 = vst [vmem:[%s1393_s21 + $0x58] sm:$0xff] %v950_v30 }
 0x224   : >> { %953 = vst [vmem:[%s1393_s21 + $0x60] sm:$0xff] %v952_v31 }
 0x225   : >> { %955 = vst [vmem:[%s1393_s21 + $0x68] sm:$0xff] %v954_v32 }
 0x226   : >> { %957 = vst [vmem:[%s1393_s21 + $0x70] sm:$0xff] %v956_v33 }
 0x227   : >> { %959 = vst [vmem:[%s1393_s21 + $0x78] sm:$0xff] %v958_v34 }
 0x228   : >> { %961 = vst [vmem:[%s1393_s21 + $0x80] sm:$0xff] %v960_v35 }
 0x229   : >> { %963 = vst [vmem:[%s1393_s21 + $0x88] sm:$0xff] %v962_v36 }
 0x22a   : >> { %965 = vst [vmem:[%s1393_s21 + $0x90] sm:$0xff] %v964_v37 }
 0x22b   : >> { %967 = vst [vmem:[%s1393_s21 + $0x98] sm:$0xff] %v966_v40 }
 0x22c   : >> { %969 = vst [vmem:[%s1393_s21 + $0xa0] sm:$0xff] %v968_v41 }
 0x22d   : >> { %971 = vst [vmem:[%s1393_s21 + $0xa8] sm:$0xff] %v970_v42 }
 0x22e   : >> { %973 = vst [vmem:[%s1393_s21 + $0xb0] sm:$0xff] %v972_v43 }
 0x22f   : >> { %975 = vst [vmem:[%s1393_s21 + $0xb8] sm:$0xff] %v974_v44 }
 0x230   : >> { %977 = vst [vmem:[%s1393_s21 + $0xc0] sm:$0xff] %v976_v45 }
 0x231   : >> { %979 = vst [vmem:[%s1393_s21 + $0xc8] sm:$0xff] %v978_v46 }
 0x232   : >> { %981 = vst [vmem:[%s1393_s21 + $0xd0] sm:$0xff] %v980_v47 }
 0x233   : >> { %983 = vst [vmem:[%s1393_s21 + $0xd8] sm:$0xff] %v982_v48  ;;  %924 = sbr.rel (!%p921_p12) target bundleno = 535 (0x217), region = 130 }
 0x234   : >> { %985 = vst [vmem:[%s1393_s21 + $0xe0] sm:$0xff] %v984_v49 }
 0x235   : >> { %987 = vst [vmem:[%s1393_s21 + $0xe8] sm:$0xff] %v986_v50 }
 0x236   : >> { %989 = vst [vmem:[%s1393_s21 + $0xf0] sm:$0xff] %v988_v51 }
 0x237   : >> { %991 = vst [vmem:[%s1393_s21 + $0xf8] sm:$0xff] %v990_v52  ;;  %s1928_s21 = smov %s1836_s28 }
 0x238 PF: > { %s1901_s29 = sand.u32 31, %s1935_s18   ;;  %s1215_s30 = sshll.u32 %s1790_s17, 8 }
 0x239   : > { %s1003_s15 = scalar_lea.vmem %s1649_s10, %s1215_s30 [#allocation2]   ;;  %s1005_s7 = scalar_lea.vmem %s1784_s14, %s1215_s30  }
 0x23a   : > { %p1209_p13 = scmp.le.s32.totalorder %s1901_s29, 0 }
 0x23b   : > { %s1407_s8 = smov (!%p1209_p13), %s1005_s7   ;;  %s1411_s9 = smov (!%p1209_p13), %s1003_s15  }
 0x23c   : > { %1096 = sbr.rel (%p1209_p13) target bundleno = 585 (0x249), region = 135  ;;  %s1415_s11 = smov (!%p1209_p13), 0  }
 0x23d   : > { %s1419_s12 = smov (!%p1209_p13), 0  }
 0x241 LB: >> { %v1015_v38 = vld [vmem:[%s1413_s9] sm:$0xff]  ;;  %s1017_s18 = sadd.s32 1, %s1417_s11  ;;  %s1009_s12 = sadd.s32 1, %s1421_s12   ;;  %s1421_s12 = sphi %s1419_s12, %s1009_s12   ;;  %s1417_s11 = sphi %s1415_s11, %s1416_s11   ;;  %s1413_s9 = sphi %s1411_s9, %s1022_s9   ;;  %s1409_s8 = sphi %s1407_s8, %s1023_s8  }
 0x242   : >> { %1016 = vst [vmem:[%s1409_s8] sm:$0xff] %v1015_v38  ;;  %p1018_p0 = scmp.ge.s32.totalorder %s1017_s18, %s1901_s29  ;;  %p1008_p1 = scmp.ge.s32.totalorder %s1009_s12, %s1901_s29 }
 0x244   : >> { %s1939_s18 = smov (%p1018_p0, %s1017_s18), 0  ;;  %1011 = sbr.rel (!%p1008_p1) target bundleno = 577 (0x241), region = 141 }
 0x245   : >> { %s1210_s10 = sshll.u32 %s1939_s18, 3  ;;  %s1416_s11 = smov %s1939_s18  }
 0x246   : >> { %s1022_s9 = scalar_lea.vmem %s1003_s15, %s1210_s10 [#allocation2]   ;;  %s1023_s8 = scalar_lea.vmem %s1005_s7, %s1210_s10  }
 0x249 PF: > { %p12_p2 = scmp.ge.s32.totalorder %s1468_s22, 5   ;;  %s1931_s18 = smov %s1385_s19 }
 0x24a   : > { %s1932_s19 = smov %s1476_s25  ;;  %s1933_s20 = smov %s1468_s22 }
 0x24b   :  { %14 = sbr.rel (!%p12_p2) target bundleno = 2 (0x2), region = 152 }

</bundles_post_ra>
